<compile_context>
chip_gen: v6e
topology: v6e:2x2x1
jax: 0.10.0
libtpu: 0.0.40
codegen_flags: <defaults>
</compile_context>

<pallas_src>
import jax
import jax.numpy as jnp
from jax.experimental import pallas as pl
from jax.experimental.pallas import tpu as pltpu

# ---------------- configuration (DGCNN defaults) ----------------
LATENT_DIM = (32, 32, 32, 1)
TOTAL_LATENT = sum(LATENT_DIM)                      # 97
CH_PAD = 128                                        # lane-dense padded channel width
K_SORT = 30                                         # k of SortPooling
CONV1D_CH = (16, 32)
CONV1D_KW2 = 5
POOLED_LEN = (K_SORT - 2) // 2 + 1                  # 15 after MaxPool1d(2,2)
CONV2_LEN = POOLED_LEN - CONV1D_KW2 + 1             # 11
DENSE_DIM = CONV2_LEN * CONV1D_CH[1]                # 352
OUTPUT_DIM = 1024                                   # DGCNN embedding dim
HIDDEN = 100                                        # MLPClassifier hidden size
HIDDEN_PAD = 128                                    # lane-padded hidden width
CLASS_PAD = 128                                     # lane-padded class width
BT = 8                                              # graphs per head grid step
NEG_INF = -1e9


def _round_up(x, m):
    return ((x + m - 1) // m) * m


def _zero_map(ndim):
    return lambda b: (0,) * ndim


# ---------------- Kernel A: per-graph graph-convolution stack ----------------
def _gconv_kernel(adj_ref, x_ref, invdeg_ref,
                  w0_ref, b0_ref, w1_ref, b1_ref, w2_ref, b2_ref, w3_ref, b3_ref,
                  out_ref):
    adj = adj_ref[0]                                 # (MAX_N, MAX_N) bf16, (A_g + I), zero-padded
    inv_deg = invdeg_ref[0]                          # (MAX_N, 1) f32, 1/(deg+1), 0 on pad rows
    h = x_ref[0]                                     # (MAX_N, F) f32

    chunks = []
    # layers 0..2 (width 32):  h <- tanh(((A+I) @ h) @ W * inv_deg + b * inv_deg)
    for w_ref, b_ref in ((w0_ref, b0_ref), (w1_ref, b1_ref), (w2_ref, b2_ref)):
        pooled = jnp.dot(adj, h.astype(jnp.bfloat16),
                         preferred_element_type=jnp.float32)
        lin = jnp.dot(pooled.astype(jnp.bfloat16), w_ref[...],
                      preferred_element_type=jnp.float32) + b_ref[...]
        h = jnp.tanh(lin * inv_deg)
        chunks.append(h)

    # layer 3 (width 1), reassociated:  (A+I) @ (h @ w3)  — 32x fewer N^2 FLOPs
    hw = jnp.dot(h.astype(jnp.bfloat16), w3_ref[...],
                 preferred_element_type=jnp.float32)              # (MAX_N, 1)
    pooled3 = jnp.dot(adj, hw.astype(jnp.bfloat16),
                      preferred_element_type=jnp.float32)         # (MAX_N, 1)
    chunks.append(jnp.tanh((pooled3 + b3_ref[...]) * inv_deg))

    max_n = adj.shape[0]
    pad = jnp.zeros((max_n, CH_PAD - TOTAL_LATENT), jnp.float32)
    out_ref[0] = jnp.concatenate(chunks + [pad], axis=1)          # one lane-dense store


def gconv_pallas(adj_hat, node_feat, inv_deg, gconv_w, gconv_b):
    bsz, max_n, _ = adj_hat.shape
    f = node_feat.shape[-1]

    inputs = [adj_hat, node_feat, inv_deg]
    in_specs = [
        pl.BlockSpec((1, max_n, max_n), lambda b: (b, 0, 0)),
        pl.BlockSpec((1, max_n, f), lambda b: (b, 0, 0)),
        pl.BlockSpec((1, max_n, 1), lambda b: (b, 0, 0)),
    ]
    for w, bias in zip(gconv_w, gconv_b):
        inputs += [w, bias]
        in_specs += [pl.BlockSpec(w.shape, _zero_map(w.ndim)),
                     pl.BlockSpec(bias.shape, _zero_map(bias.ndim))]

    # per-step VMEM footprint (double-buffered adj/feat/out), kept well under
    # v7x's 64 MiB while raising the default scoped limit for larger graphs.
    block_bytes = (2 * max_n * max_n          # bf16 adjacency block
                   + 4 * max_n * f + 4 * max_n
                   + 4 * max_n * CH_PAD)
    vmem_limit = min(max(6 * block_bytes, 32 << 20), 48 << 20)

    return pl.pallas_call(
        _gconv_kernel,
        grid=(bsz,),
        out_shape=jax.ShapeDtypeStruct((bsz, max_n, CH_PAD), jnp.float32),
        in_specs=in_specs,
        out_specs=pl.BlockSpec((1, max_n, CH_PAD), lambda b: (b, 0, 0)),
        compiler_params=pltpu.CompilerParams(
            dimension_semantics=("parallel",),
            vmem_limit_bytes=vmem_limit),
    )(*inputs)


# ---------------- SortPooling (plain-JAX glue: top-k + gather + pad) ----------------
def sort_pooling(feats, graph_sizes):
    # TODO(synk): data-dependent per-graph top-k + gather stays in plain JAX.
    pooled = []
    for i, sz in enumerate(graph_sizes):
        kk = min(K_SORT, sz)
        _, idx = jax.lax.top_k(feats[i, :sz, TOTAL_LATENT - 1], kk)
        rows = feats[i][idx]                                       # (kk, CH_PAD)
        if kk < K_SORT:
            rows = jnp.concatenate(
                [rows, jnp.zeros((K_SORT - kk, CH_PAD), rows.dtype)], axis=0)
        pooled.append(rows)
    return jnp.stack(pooled, axis=0)                               # (B, K_SORT, CH_PAD)


# ---------------- Kernel B: batched conv1d head + dense + MLP classifier ----------------
def _head_kernel(pooled_ref, w1c_ref, b1c_ref, w2c_ref, b2c_ref,
                 wd_ref, bd_ref, wh1_ref, bh1_ref, wh2_ref, bh2_ref,
                 out_ref):
    x = pooled_ref[...].reshape(BT * K_SORT, CH_PAD)               # (BT*30, 128)

    # Conv1d(1,16,97,stride=97) == row-wise matmul (channel-pad rows of w1c are 0) + ReLU
    z1 = jnp.dot(x, w1c_ref[...], preferred_element_type=jnp.float32) + b1c_ref[...]
    z1 = jnp.maximum(z1, 0.0)                                      # (BT*30, 16)

    # MaxPool1d(2,2) over positions, register-resident (30 is even -> pairs
    # never cross a graph boundary)
    zp = jnp.max(z1.reshape(BT * POOLED_LEN, 2, CONV1D_CH[0]), axis=1)
    zp = zp.reshape(BT, POOLED_LEN, CONV1D_CH[0])                  # (BT, 15, 16)

    # Conv1d(16,32,5,stride=1): 5 shifted (BT*11,16)@(16,32) matmuls
    conv2 = jnp.zeros((BT, CONV2_LEN, CONV1D_CH[1]), jnp.float32)
    for tau in range(CONV1D_KW2):
        sl = zp[:, tau:tau + CONV2_LEN, :].reshape(BT * CONV2_LEN, CONV1D_CH[0])
        conv2 = conv2 + jnp.dot(sl, w2c_ref[tau],
                                preferred_element_type=jnp.float32
                                ).reshape(BT, CONV2_LEN, CONV1D_CH[1])
    conv2 = jnp.maximum(conv2 + b2c_ref[...], 0.0)                 # (BT, 11, 32)

    # Linear(352,1024): one fused K=352 matmul; torch's channel-major flatten is
    # folded into wd_ref's layout. ReLU(ReLU(.)) collapsed to one ReLU.
    flat = conv2.reshape(BT, DENSE_DIM)                            # (BT, 352)
    embed = jnp.maximum(
        jnp.dot(flat, wd_ref[...], preferred_element_type=jnp.float32) + bd_ref[...],
        0.0)                                                       # (BT, 1024)

    # MLPClassifier: Linear(1024,100)+ReLU + Linear(100,C) + log_softmax
    # (hidden / class dims lane-padded to 128; padded logits biased to -1e9)
    h1 = jnp.maximum(
        jnp.dot(embed, wh1_ref[...], preferred_element_type=jnp.float32) + bh1_ref[...],
        0.0)                                                       # (BT, 128)
    logits = jnp.dot(h1, wh2_ref[...], preferred_element_type=jnp.float32) + bh2_ref[...]
    m = jnp.max(logits, axis=-1, keepdims=True)
    s = logits - m
    logp = s - jnp.log(jnp.sum(jnp.exp(s), axis=-1, keepdims=True))
    out_ref[...] = logp                                            # (BT, 128) lane-dense


def head_pallas(pooled, p, num_class):
    batch = pooled.shape[0]
    b_pad = _round_up(max(batch, BT), BT)
    if b_pad != batch:
        pooled = jnp.concatenate(
            [pooled, jnp.zeros((b_pad - batch, K_SORT, CH_PAD), pooled.dtype)], axis=0)

    weights = [p["w1c_t"], p["b1c"], p["w2c_t"], p["b2c"],
               p["wd_flat"], p["bd"], p["wh1_t"], p["bh1"], p["wh2_t"], p["bh2"]]
    in_specs = [pl.BlockSpec((BT, K_SORT, CH_PAD), lambda b: (b, 0, 0))]
    for w in weights:
        in_specs.append(pl.BlockSpec(w.shape, _zero_map(w.ndim)))

    out = pl.pallas_call(
        _head_kernel,
        grid=(b_pad // BT,),
        out_shape=jax.ShapeDtypeStruct((b_pad, CLASS_PAD), jnp.float32),
        in_specs=in_specs,
        out_specs=pl.BlockSpec((BT, CLASS_PAD), lambda b: (b, 0)),
        compiler_params=pltpu.CompilerParams(dimension_semantics=("parallel",)),
    )(pooled, *weights)
    return out[:batch, :num_class]


# ---------------- parameters (deterministic synthetic init) ----------------
def init_params(key, num_node_feats, num_class):
    keys = jax.random.split(key, 20)

    def nrm(k, shape, scale=0.1):
        return scale * jax.random.normal(k, shape, dtype=jnp.float32)

    p = {}
    dims = (num_node_feats,) + LATENT_DIM
    gw, gb = [], []
    for i in range(len(LATENT_DIM)):
        w = nrm(keys[i], (LATENT_DIM[i], dims[i]))       # torch Linear weight (out, in)
        b = nrm(keys[i + 4], (LATENT_DIM[i],))
        gw.append(w.T.astype(jnp.bfloat16))              # (in, out) bf16 MXU operand
        gb.append(b.reshape(1, -1))                      # f32 bias
    p["gconv_w"], p["gconv_b"] = gw, gb

    w1c = nrm(keys[8], (CONV1D_CH[0], 1, TOTAL_LATENT))  # Conv1d(1,16,97)
    w1c_t = w1c[:, 0, :].T                               # (97, 16)
    p["w1c_t"] = jnp.zeros((CH_PAD, CONV1D_CH[0]), jnp.float32).at[:TOTAL_LATENT].set(w1c_t)
    p["b1c"] = nrm(keys[9], (CONV1D_CH[0],)).reshape(1, -1)

    w2c = nrm(keys[10], (CONV1D_CH[1], CONV1D_CH[0], CONV1D_KW2))  # Conv1d(16,32,5)
    p["w2c_t"] = jnp.transpose(w2c, (2, 1, 0))           # (5, 16, 32) [tau, in, out]
    p["b2c"] = nrm(keys[11], (CONV1D_CH[1],)).reshape(1, 1, -1)

    wd = nrm(keys[12], (OUTPUT_DIM, DENSE_DIM))          # Linear(352, 1024)
    # torch flatten of (B,32,11) is channel-major (o*11+t); kernel flatten is (t*32+o)
    p["wd_flat"] = jnp.transpose(
        wd.reshape(OUTPUT_DIM, CONV1D_CH[1], CONV2_LEN), (2, 1, 0)
    ).reshape(DENSE_DIM, OUTPUT_DIM)                     # (352, 1024)
    p["bd"] = nrm(keys[13], (OUTPUT_DIM,)).reshape(1, -1)

    wh1 = nrm(keys[14], (HIDDEN, OUTPUT_DIM))            # MLP Linear(1024,100)
    p["wh1_t"] = jnp.zeros((OUTPUT_DIM, HIDDEN_PAD), jnp.float32).at[:, :HIDDEN].set(wh1.T)
    p["bh1"] = jnp.zeros((1, HIDDEN_PAD), jnp.float32).at[:, :HIDDEN].set(
        nrm(keys[15], (HIDDEN,)))
    wh2 = nrm(keys[16], (num_class, HIDDEN))             # MLP Linear(100, C)
    p["wh2_t"] = jnp.zeros((HIDDEN_PAD, CLASS_PAD), jnp.float32
                           ).at[:HIDDEN, :num_class].set(wh2.T)
    p["bh2"] = jnp.full((1, CLASS_PAD), NEG_INF, jnp.float32).at[:, :num_class].set(
        nrm(keys[17], (num_class,)))
    return p


# ---------------- batching prep (stand-in for GNNLIB.PrepareSparseMatrices) ----------------
def prepare_batch(adj_list, feat_list, graph_sizes):
    # Exploit the block-diagonal n2n adjacency: pack each graph's (A_g + I)
    # block, features and 1/(deg+1) into padded per-graph slots.
    bsz = len(graph_sizes)
    max_n = max(8, _round_up(max(graph_sizes), 8))
    f = feat_list[0].shape[-1]
    adj_hat = jnp.zeros((bsz, max_n, max_n), jnp.float32)
    node_feat = jnp.zeros((bsz, max_n, f), jnp.float32)
    inv_deg = jnp.zeros((bsz, max_n, 1), jnp.float32)
    for i, (a, x, sz) in enumerate(zip(adj_list, feat_list, graph_sizes)):
        deg = a.sum(axis=1) + 1.0                        # degs + 1, as in forward()
        adj_hat = adj_hat.at[i, :sz, :sz].set(a + jnp.eye(sz, dtype=jnp.float32))
        node_feat = node_feat.at[i, :sz, :].set(x)
        inv_deg = inv_deg.at[i, :sz, 0].set(1.0 / deg)
    return adj_hat.astype(jnp.bfloat16), node_feat, inv_deg   # adj 0/1 exact in bf16


# ---------------- full forward ----------------
def dgcnn_forward(params, adj_list, feat_list, graph_sizes, num_class):
    adj_hat, node_feat, inv_deg = prepare_batch(adj_list, feat_list, graph_sizes)
    feats = gconv_pallas(adj_hat, node_feat, inv_deg,
                         params["gconv_w"], params["gconv_b"])    # (B, MAX_N, 128)
    pooled = sort_pooling(feats, graph_sizes)                     # (B, 30, 128)
    return head_pallas(pooled, params, num_class)                 # (B, C) log-probs


if __name__ == "__main__":
    NUM_NODE_FEATS = 8
    NUM_CLASS = 3
    GRAPH_SIZES = (20, 12)          # two graphs in the batch

    key = jax.random.PRNGKey(0)
    k_param, k_feat, k_adj = jax.random.split(key, 3)
    params = init_params(k_param, NUM_NODE_FEATS, NUM_CLASS)

    adj_list, feat_list = [], []
    for i, sz in enumerate(GRAPH_SIZES):
        ka = jax.random.fold_in(k_adj, i)
        m = jax.random.bernoulli(ka, 0.3, (sz, sz)).astype(jnp.float32)
        m = jnp.triu(m, 1)
        adj_list.append(m + m.T)                         # symmetric 0/1, zero diagonal
        kf = jax.random.fold_in(k_feat, i)
        feat_list.append(jax.random.normal(kf, (sz, NUM_NODE_FEATS), dtype=jnp.float32))

    logp = dgcnn_forward(params, adj_list, feat_list, GRAPH_SIZES, NUM_CLASS)
    jax.block_until_ready(logp)
    assert logp.shape == (len(GRAPH_SIZES), NUM_CLASS)
    assert bool(jnp.all(jnp.isfinite(logp)))
    print("KERNEL_OK")
</pallas_src>

<mosaic_0001>
module attributes {stable_mosaic.version = 11 : i64} {
  func.func @_gconv_kernel(%arg0: i32, %arg1: memref<1x24x24xbf16, #tpu.memory_space<vmem>>, %arg2: memref<1x24x8xf32, #tpu.memory_space<vmem>>, %arg3: memref<1x24x1xf32, #tpu.memory_space<vmem>>, %arg4: memref<8x32xbf16, #tpu.memory_space<vmem>>, %arg5: memref<1x32xf32, #tpu.memory_space<vmem>>, %arg6: memref<32x32xbf16, #tpu.memory_space<vmem>>, %arg7: memref<1x32xf32, #tpu.memory_space<vmem>>, %arg8: memref<32x32xbf16, #tpu.memory_space<vmem>>, %arg9: memref<1x32xf32, #tpu.memory_space<vmem>>, %arg10: memref<32x1xbf16, #tpu.memory_space<vmem>>, %arg11: memref<1x1xf32, #tpu.memory_space<vmem>>, %arg12: memref<1x24x128xf32, #tpu.memory_space<vmem>>) attributes {dimension_semantics = [#tpu.dimension_semantics<parallel>], iteration_bounds = array<i64: 2>, scalar_prefetch = 0 : i64, scratch_operands = 0 : i64, tpu.core_type = #tpu.core_type<tc>, window_params = [{transform_indices = @transform_0, window_bounds = array<i64: 1, 24, 24>}, {transform_indices = @transform_1, window_bounds = array<i64: 1, 24, 8>}, {transform_indices = @transform_2, window_bounds = array<i64: 1, 24, 1>}, {pipeline_mode = #tpu.pipeline_mode<synchronous>, transform_indices = @transform_3, window_bounds = array<i64: 8, 32>}, {pipeline_mode = #tpu.pipeline_mode<synchronous>, transform_indices = @transform_4, window_bounds = array<i64: 1, 32>}, {pipeline_mode = #tpu.pipeline_mode<synchronous>, transform_indices = @transform_5, window_bounds = array<i64: 32, 32>}, {pipeline_mode = #tpu.pipeline_mode<synchronous>, transform_indices = @transform_6, window_bounds = array<i64: 1, 32>}, {pipeline_mode = #tpu.pipeline_mode<synchronous>, transform_indices = @transform_7, window_bounds = array<i64: 32, 32>}, {pipeline_mode = #tpu.pipeline_mode<synchronous>, transform_indices = @transform_8, window_bounds = array<i64: 1, 32>}, {pipeline_mode = #tpu.pipeline_mode<synchronous>, transform_indices = @transform_9, window_bounds = array<i64: 32, 1>}, {pipeline_mode = #tpu.pipeline_mode<synchronous>, transform_indices = @transform_10, window_bounds = array<i64: 1, 1>}, {transform_indices = @transform_11, window_bounds = array<i64: 1, 24, 128>}]} {
    %c0 = arith.constant 0 : index
    %c0_0 = arith.constant 0 : index
    %c0_1 = arith.constant 0 : index
    %0 = vector.load %arg1[%c0, %c0_0, %c0_1] : memref<1x24x24xbf16, #tpu.memory_space<vmem>>, vector<1x24x24xbf16>
    %1 = vector.shape_cast %0 : vector<1x24x24xbf16> to vector<24x24xbf16>
    %c0_2 = arith.constant 0 : index
    %c0_3 = arith.constant 0 : index
    %c0_4 = arith.constant 0 : index
    %2 = vector.load %arg3[%c0_2, %c0_3, %c0_4] : memref<1x24x1xf32, #tpu.memory_space<vmem>>, vector<1x24x1xf32>
    %3 = vector.shape_cast %2 : vector<1x24x1xf32> to vector<24x1xf32>
    %c0_5 = arith.constant 0 : index
    %c0_6 = arith.constant 0 : index
    %c0_7 = arith.constant 0 : index
    %4 = vector.load %arg2[%c0_5, %c0_6, %c0_7] : memref<1x24x8xf32, #tpu.memory_space<vmem>>, vector<1x24x8xf32>
    %5 = vector.shape_cast %4 : vector<1x24x8xf32> to vector<24x8xf32>
    %6 = arith.truncf %5 : vector<24x8xf32> to vector<24x8xbf16>
    %cst = arith.constant dense<0.000000e+00> : vector<24x8xf32>
    %7 = tpu.matmul %1, %6, %cst {dimension_numbers = #tpu.dot_dimension_numbers<[1], [0], [0], [1], [0, 0, 1, 1], [], []>} : vector<24x24xbf16>, vector<24x8xbf16>, vector<24x8xf32> -> vector<24x8xf32>
    %8 = arith.truncf %7 : vector<24x8xf32> to vector<24x8xbf16>
    %c0_8 = arith.constant 0 : index
    %c0_9 = arith.constant 0 : index
    %9 = vector.load %arg4[%c0_8, %c0_9] : memref<8x32xbf16, #tpu.memory_space<vmem>>, vector<8x32xbf16>
    %cst_10 = arith.constant dense<0.000000e+00> : vector<24x32xf32>
    %10 = tpu.matmul %8, %9, %cst_10 {dimension_numbers = #tpu.dot_dimension_numbers<[1], [0], [0], [1], [0, 0, 1, 1], [], []>} : vector<24x8xbf16>, vector<8x32xbf16>, vector<24x32xf32> -> vector<24x32xf32>
    %c0_11 = arith.constant 0 : index
    %c0_12 = arith.constant 0 : index
    %11 = vector.load %arg5[%c0_11, %c0_12] : memref<1x32xf32, #tpu.memory_space<vmem>>, vector<1x32xf32>
    %12 = vector.broadcast %11 : vector<1x32xf32> to vector<24x32xf32>
    %13 = arith.addf %10, %12 : vector<24x32xf32>
    %14 = vector.broadcast %3 : vector<24x1xf32> to vector<24x32xf32>
    %15 = arith.mulf %13, %14 : vector<24x32xf32>
    %16 = math.tanh %15 : vector<24x32xf32>
    %17 = arith.truncf %16 : vector<24x32xf32> to vector<24x32xbf16>
    %cst_13 = arith.constant dense<0.000000e+00> : vector<24x32xf32>
    %18 = tpu.matmul %1, %17, %cst_13 {dimension_numbers = #tpu.dot_dimension_numbers<[1], [0], [0], [1], [0, 0, 1, 1], [], []>} : vector<24x24xbf16>, vector<24x32xbf16>, vector<24x32xf32> -> vector<24x32xf32>
    %19 = arith.truncf %18 : vector<24x32xf32> to vector<24x32xbf16>
    %c0_14 = arith.constant 0 : index
    %c0_15 = arith.constant 0 : index
    %20 = vector.load %arg6[%c0_14, %c0_15] : memref<32x32xbf16, #tpu.memory_space<vmem>>, vector<32x32xbf16>
    %cst_16 = arith.constant dense<0.000000e+00> : vector<24x32xf32>
    %21 = tpu.matmul %19, %20, %cst_16 {dimension_numbers = #tpu.dot_dimension_numbers<[1], [0], [0], [1], [0, 0, 1, 1], [], []>} : vector<24x32xbf16>, vector<32x32xbf16>, vector<24x32xf32> -> vector<24x32xf32>
    %c0_17 = arith.constant 0 : index
    %c0_18 = arith.constant 0 : index
    %22 = vector.load %arg7[%c0_17, %c0_18] : memref<1x32xf32, #tpu.memory_space<vmem>>, vector<1x32xf32>
    %23 = vector.broadcast %22 : vector<1x32xf32> to vector<24x32xf32>
    %24 = arith.addf %21, %23 : vector<24x32xf32>
    %25 = vector.broadcast %3 : vector<24x1xf32> to vector<24x32xf32>
    %26 = arith.mulf %24, %25 : vector<24x32xf32>
    %27 = math.tanh %26 : vector<24x32xf32>
    %28 = arith.truncf %27 : vector<24x32xf32> to vector<24x32xbf16>
    %cst_19 = arith.constant dense<0.000000e+00> : vector<24x32xf32>
    %29 = tpu.matmul %1, %28, %cst_19 {dimension_numbers = #tpu.dot_dimension_numbers<[1], [0], [0], [1], [0, 0, 1, 1], [], []>} : vector<24x24xbf16>, vector<24x32xbf16>, vector<24x32xf32> -> vector<24x32xf32>
    %30 = arith.truncf %29 : vector<24x32xf32> to vector<24x32xbf16>
    %c0_20 = arith.constant 0 : index
    %c0_21 = arith.constant 0 : index
    %31 = vector.load %arg8[%c0_20, %c0_21] : memref<32x32xbf16, #tpu.memory_space<vmem>>, vector<32x32xbf16>
    %cst_22 = arith.constant dense<0.000000e+00> : vector<24x32xf32>
    %32 = tpu.matmul %30, %31, %cst_22 {dimension_numbers = #tpu.dot_dimension_numbers<[1], [0], [0], [1], [0, 0, 1, 1], [], []>} : vector<24x32xbf16>, vector<32x32xbf16>, vector<24x32xf32> -> vector<24x32xf32>
    %c0_23 = arith.constant 0 : index
    %c0_24 = arith.constant 0 : index
    %33 = vector.load %arg9[%c0_23, %c0_24] : memref<1x32xf32, #tpu.memory_space<vmem>>, vector<1x32xf32>
    %34 = vector.broadcast %33 : vector<1x32xf32> to vector<24x32xf32>
    %35 = arith.addf %32, %34 : vector<24x32xf32>
    %36 = vector.broadcast %3 : vector<24x1xf32> to vector<24x32xf32>
    %37 = arith.mulf %35, %36 : vector<24x32xf32>
    %38 = math.tanh %37 : vector<24x32xf32>
    %39 = arith.truncf %38 : vector<24x32xf32> to vector<24x32xbf16>
    %c0_25 = arith.constant 0 : index
    %c0_26 = arith.constant 0 : index
    %40 = vector.load %arg10[%c0_25, %c0_26] : memref<32x1xbf16, #tpu.memory_space<vmem>>, vector<32x1xbf16>
    %cst_27 = arith.constant dense<0.000000e+00> : vector<24x1xf32>
    %41 = tpu.matmul %39, %40, %cst_27 {dimension_numbers = #tpu.dot_dimension_numbers<[1], [0], [0], [1], [0, 0, 1, 1], [], []>} : vector<24x32xbf16>, vector<32x1xbf16>, vector<24x1xf32> -> vector<24x1xf32>
    %42 = arith.truncf %41 : vector<24x1xf32> to vector<24x1xbf16>
    %cst_28 = arith.constant dense<0.000000e+00> : vector<24x1xf32>
    %43 = tpu.matmul %1, %42, %cst_28 {dimension_numbers = #tpu.dot_dimension_numbers<[1], [0], [0], [1], [0, 0, 1, 1], [], []>} : vector<24x24xbf16>, vector<24x1xbf16>, vector<24x1xf32> -> vector<24x1xf32>
    %c0_29 = arith.constant 0 : index
    %c0_30 = arith.constant 0 : index
    %44 = vector.load %arg11[%c0_29, %c0_30] : memref<1x1xf32, #tpu.memory_space<vmem>>, vector<1x1xf32>
    %45 = vector.broadcast %44 : vector<1x1xf32> to vector<24x1xf32>
    %46 = arith.addf %43, %45 : vector<24x1xf32>
    %47 = arith.mulf %46, %3 : vector<24x1xf32>
    %48 = math.tanh %47 : vector<24x1xf32>
    %cst_31 = arith.constant 0.000000e+00 : f32
    %49 = vector.broadcast %cst_31 : f32 to vector<24x31xf32>
    %50 = tpu.concatenate %16, %27, %38, %48, %49 in 1 : vector<24x32xf32>, vector<24x32xf32>, vector<24x32xf32>, vector<24x1xf32>, vector<24x31xf32> -> vector<24x128xf32>
    %c0_32 = arith.constant 0 : index
    %c0_33 = arith.constant 0 : index
    %c0_34 = arith.constant 0 : index
    %51 = vector.load %arg12[%c0_32, %c0_33, %c0_34] : memref<1x24x128xf32, #tpu.memory_space<vmem>>, vector<1x24x128xf32>
    %52 = vector.shape_cast %51 : vector<1x24x128xf32> to vector<24x128xf32>
    %53 = vector.shape_cast %50 : vector<24x128xf32> to vector<1x24x128xf32>
    tpu.vector_store %arg12[%c0_32, %c0_33, %c0_34], %53 {strides = array<i32>} : memref<1x24x128xf32, #tpu.memory_space<vmem>>, vector<1x24x128xf32>,
    return
  }
  func.func @transform_0(%arg0: i32) -> (i32, i32, i32) {
    %c0_i32 = arith.constant 0 : i32
    %c0_i32_0 = arith.constant 0 : i32
    %c0_i32_1 = arith.constant 0 : i32
    return %arg0, %c0_i32, %c0_i32_0 : i32, i32, i32
  }
  func.func @transform_1(%arg0: i32) -> (i32, i32, i32) {
    %c0_i32 = arith.constant 0 : i32
    %c0_i32_0 = arith.constant 0 : i32
    %c0_i32_1 = arith.constant 0 : i32
    return %arg0, %c0_i32, %c0_i32_0 : i32, i32, i32
  }
  func.func @transform_2(%arg0: i32) -> (i32, i32, i32) {
    %c0_i32 = arith.constant 0 : i32
    %c0_i32_0 = arith.constant 0 : i32
    %c0_i32_1 = arith.constant 0 : i32
    return %arg0, %c0_i32, %c0_i32_0 : i32, i32, i32
  }
  func.func @transform_3(%arg0: i32) -> (i32, i32) {
    %c0_i32 = arith.constant 0 : i32
    %c0_i32_0 = arith.constant 0 : i32
    %c0_i32_1 = arith.constant 0 : i32
    return %c0_i32, %c0_i32_0 : i32, i32
  }
  func.func @transform_4(%arg0: i32) -> (i32, i32) {
    %c0_i32 = arith.constant 0 : i32
    %c0_i32_0 = arith.constant 0 : i32
    %c0_i32_1 = arith.constant 0 : i32
    return %c0_i32, %c0_i32_0 : i32, i32
  }
  func.func @transform_5(%arg0: i32) -> (i32, i32) {
    %c0_i32 = arith.constant 0 : i32
    %c0_i32_0 = arith.constant 0 : i32
    %c0_i32_1 = arith.constant 0 : i32
    return %c0_i32, %c0_i32_0 : i32, i32
  }
  func.func @transform_6(%arg0: i32) -> (i32, i32) {
    %c0_i32 = arith.constant 0 : i32
    %c0_i32_0 = arith.constant 0 : i32
    %c0_i32_1 = arith.constant 0 : i32
    return %c0_i32, %c0_i32_0 : i32, i32
  }
  func.func @transform_7(%arg0: i32) -> (i32, i32) {
    %c0_i32 = arith.constant 0 : i32
    %c0_i32_0 = arith.constant 0 : i32
    %c0_i32_1 = arith.constant 0 : i32
    return %c0_i32, %c0_i32_0 : i32, i32
  }
  func.func @transform_8(%arg0: i32) -> (i32, i32) {
    %c0_i32 = arith.constant 0 : i32
    %c0_i32_0 = arith.constant 0 : i32
    %c0_i32_1 = arith.constant 0 : i32
    return %c0_i32, %c0_i32_0 : i32, i32
  }
  func.func @transform_9(%arg0: i32) -> (i32, i32) {
    %c0_i32 = arith.constant 0 : i32
    %c0_i32_0 = arith.constant 0 : i32
    %c0_i32_1 = arith.constant 0 : i32
    return %c0_i32, %c0_i32_0 : i32, i32
  }
  func.func @transform_10(%arg0: i32) -> (i32, i32) {
    %c0_i32 = arith.constant 0 : i32
    %c0_i32_0 = arith.constant 0 : i32
    %c0_i32_1 = arith.constant 0 : i32
    return %c0_i32, %c0_i32_0 : i32, i32
  }
  func.func @transform_11(%arg0: i32) -> (i32, i32, i32) {
    %c0_i32 = arith.constant 0 : i32
    %c0_i32_0 = arith.constant 0 : i32
    %c0_i32_1 = arith.constant 0 : i32
    return %arg0, %c0_i32, %c0_i32_0 : i32, i32, i32
  }
}

</mosaic_0001>

<bundles_post_ra>
// kernel: tpu_custom_call.1
= control target key start
LH: loop header
LB: loop body
LE: loop exit
PB: predicated region body
PF: predicated region fallthrough
CT: control target
= control target key end

     0   :  { %s1742_s0 = inlined_call_operand.vmem [shape: bf16[2,24,24], index: 0, kind: input, shape index: {}]   ;;  %s1743_s1 = inlined_call_operand.vmem [shape: f32[2,24,8], index: 1, kind: input, shape index: {}]   ;;  %s1744_s2 = inlined_call_operand.vmem [shape: f32[2,24,1], index: 2, kind: input, shape index: {}]   ;;  %s1745_s3 = inlined_call_operand.vmem [shape: bf16[8,32], index: 3, kind: input, shape index: {}]   ;;  %s1746_s4 = inlined_call_operand.vmem [shape: f32[1,32], index: 4, kind: input, shape index: {}]   ;;  %s1747_s5 = inlined_call_operand.vmem [shape: bf16[32,32], index: 5, kind: input, shape index: {}]   ;;  %s1748_s6 = inlined_call_operand.vmem [shape: f32[1,32], index: 6, kind: input, shape index: {}]   ;;  %s1749_s7 = inlined_call_operand.vmem [shape: bf16[32,32], index: 7, kind: input, shape index: {}]   ;;  %s1750_s8 = inlined_call_operand.vmem [shape: f32[1,32], index: 8, kind: input, shape index: {}]   ;;  %s1751_s9 = inlined_call_operand.vmem [shape: bf16[32,1], index: 9, kind: input, shape index: {}]   ;;  %s1752_s10 = inlined_call_operand.<no memory space> [shape: f32[1,1], index: 10, kind: input, shape index: {}]   ;;  %s1753_s11 = inlined_call_operand.hbm [shape: f32[2,24,128], index: 11, kind: output, shape index: {}]  }
   0x1   :  { %v16_v0 = vstv %s1752_s10 }
   0x2   :  { %17 = vst [vmem:[#allocation2] sm:$0x1] %v16_v0 }
   0x3   :  { %18 = vsyncpa [#allocation4], 0 }
   0x4   :  { %20 = vsyncpa [#allocation4 + $0x1], 0  ;;  %s1515_s19 = smov 0   ;;  %s1517_s20 = smov 0  }
   0x5   :  { %s1519_s21 = smov 0   ;;  %s1521_s22 = smov 0  }
   0x6 LB: > { %s1536_s10 = sadd.s32 4294967295, %s1443_s22   ;;  %s1164_s23 = sadd.s32 4294967294, %s1443_s22   ;;  %s1443_s22 = sphi %s1521_s22, %s1759_s22   ;;  %s1439_s21 = sphi %s1519_s21, %s1758_s21   ;;  %s1435_s20 = sphi %s1517_s20, %s1757_s20   ;;  %s1431_s19 = sphi %s1515_s19, %s1756_s19  }
   0x7   : > { %s1540_s24 = sadd.s32 1, %s1443_s22   ;;  %s279_s25 = sadd.s32 1, %s1439_s21 }
   0x8   : > { %s276_s26 = ssub.s32 %s1443_s22, %s1540_s24  ;;  %p289_p0 = scmp.ne.s32.totalorder %s1439_s21, %s1435_s20 }
   0x9   : > { %p277_p1 = scmp.eq.s32.totalorder %s276_s26, 0  ;;  %p290_p2 = scmp.eq.s32.totalorder %s1536_s10, 1 }
   0xa   : > { %p295_p3 = scmp.ne.s32.totalorder %s1435_s20, %s1431_s19  ;;  %p296_p4 = scmp.eq.s32.totalorder %s1164_s23, 1 }
   0xb   : > { %s1551_s27 = scalar_select %p277_p1, %s1439_s21, %s279_s25  }
   0xc   : > { %p1553_p5 = por %p290_p2, %p289_p0  ;;  %p1557_p6 = por %p296_p4, %p295_p3 }
   0xd   : > { %p1167_p7 = scmp.ge.s32.totalorder %s1443_s22, 1  ;;  %p362_p8 = scmp.lt.s32.totalorder %s1443_s22, 3 }
   0xf   : > { %p363_p9 = pnand %p1167_p7, %p362_p8 }
  0x10   : > { %p412_p10 = scmp.lt.s32.totalorder (!%p363_p9), %s1536_s10, 1  ;;  %s1303_s15 = smul.u32 (!%p363_p9), 384, %s1536_s10 }
  0x11   : > { %366 = sbr.rel (%p363_p9) target bundleno = 1864 (0x748), region = 64 }
  0x16   : > { %s413_s30 = scalar_select %p412_p10, %s1536_s10, 1  ;;  %vm447_vm0 = vcmask 195584   ;;  %vm454_vm1 = vcmask 1043456   ;;  %v508_v9 = vld [vmem:[%s1745_s3] sm:$0xf]  ;;  %v1445_v11 = vmov 0  }
  0x17   : > { %1296 = vmatprep.subr.msk.bf16.mxu1 %vm454_vm1, %v508_v9  ;;  %v524_v10 = vsel %vm454_vm1, %v508_v9, 0  ;;  %1349 = vset.pattern.permute.xlu0 %v1445_v11  ;;  %vm516_vm2 = vcmask 64512   ;;  %v1175_v22 = vld [vmem:[%s1746_s4] ss:$0 sm:$0xff]  ;;  %v1353_v41 = vld [vmem:[%s1747_s5 + $0x8] sm:$0xff]   ;;  %vm673_vm3 = vcmask 261120  }
  0x18   : > { %s1301_s12 = smul.u32 12, %s413_s30  ;;  %1242 = vmatpush3.bf16.msra.mxu1 %v524_v10  ;;  %1350 = vset.pattern.permute.xlu1 %v1445_v11  ;;  %v1354_v42 = vld [vmem:[%s1747_s5] sm:$0xff]   ;;  %vm1053_vm4 = vcmask 785408   ;;  %vm1049_vm5 = vcmask 523264   ;;  %vm1057_vm6 = vcmask 793600  }
  0x19   : > { %s1302_s13 = smul.u32 24, %s413_s30  ;;  %v1180_v49 = vld [vmem:[%s1748_s6] ss:$0 sm:$0xff]  ;;  %s1446_s30 = smov 32  }
  0x1a   : > { %s416_s16 = scalar_lea.vmem %s1742_s0, %s1301_s12  ;;  %s1448_s12 = smov 96  }
  0x1b   : > { %s421_s23 = scalar_lea.vmem %s1743_s1, %s1302_s13  ;;  %v1571_v1 = vld [vmem:[%s416_s16] sm:$0xff]   ;;  %v1577_v8 = vld [vmem:[%s416_s16 + $0x8] ss:$0 sps:$4 sm:$0xff]   ;;  %s426_s14 = scalar_lea.vmem %s1744_s2, %s1302_s13 }
  0x1c   : > { %v436_v2 = vld [vmem:[%s421_s23 + $0x10] sm:$0xff]  ;;  %v434_v3 = vld [vmem:[%s421_s23] sm:$0xff]  ;;  %v435_v4 = vld [vmem:[%s421_s23 + $0x8] sm:$0xff]  ;;  %1237 = vmatprep.mubr.msk.bf16.mxu0 %vm447_vm0, %v1571_v1  ;;  %s1694_s23 = scalar_lea.hbm %s1753_s11, %s1303_s15 }
  0x1d   : > { %v438_v5 = vpack.c.bf16 %v436_v2, %v436_v2  ;;  %v437_v6 = vpack.c.bf16 %v435_v4, %v434_v3  ;;  %v1589_v12 = vld [vmem:[%s426_s14 + $0x10] sm:$0xff]  ;;  %v1591_v13 = vld [vmem:[%s426_s14 + $0x8] sm:$0xff]  ;;  %v1595_v14 = vld [vmem:[%s426_s14] sm:$0xff]  ;;  %s409_s14 = sand.u32 1, %s1435_s20  }
  0x1e   : > { %586 = vperm.xlu0 %1349, %v1589_v12   ;;  %581 = vperm.xlu1 %1350, %v1591_v13   ;;  %v1355_v3 = vld [vmem:[%s1749_s7 + $0x8] sm:$0xff]   ;;  %v1356_v4 = vld [vmem:[%s1749_s7] sm:$0xff]   ;;  %s1300_s13 = smul.u32 24, %s409_s14  ;;  %s1702_s25 = scalar_lea.sflag [#allocation4], %s409_s14 }
  0x1f   : > { %1295 = vmatprep.subr.msk.bf16.mxu0 %vm454_vm1, %v438_v5  ;;  %v456_v7 = vsel %vm454_vm1, %v438_v5, 0 }
  0x20   : > { %1234 = vmatpush3.bf16.msra.mxu0 %v456_v7  ;;  %s411_s16 = scalar_lea.vmem [#allocation3], %s1300_s13 }
  0x21   : > { %1235 = vmatprep.subr.bf16.mxu0 %v437_v6  ;;  %s1078_s17 = sshll.u32 %s411_s16, 4  ;;  %s1689_s17 = int_to_ptr.vmem [resolvable:$true] %s1078_s17 }
  0x22   : > { %576 = vperm.xlu0 %1349, %v1595_v14   ;;  %s1383_s26 = scalar_lea.vmem %s1689_s17, 384 }
  0x23   : > { %p1384_p11 = scmp.ne.s32.totalorder %s1689_s17, %s1383_s26 }
  0x24   : > { %1236 = vmatpush3.bf16.msra.mxu0 %v437_v6 }
  0x25   : > { %1255 = vmatprep.subr.bf16.mxu0 %v1353_v41  ;;  %p1385_p12 = pnand %p1384_p11, %p1553_p5 }
  0x27   : > { %1238 = vmatmul.mubr.msk.bf16.vlgmr.msra.gmra.mxu0 %vm447_vm0, %v1577_v8  ;;  %p1386_p13 = pneg %p1385_p12 }
  0x28   : > { %1256 = vmatpush3.bf16.msra.mxu0 %v1353_v41 }
  0x29   : > { %1257 = vmatprep.subr.bf16.mxu0 %v1354_v42 }
  0x2c   : > { %1258 = vmatpush3.bf16.msra.mxu0 %v1354_v42  ;;  %v1196_v42 = vld [vmem:[#allocation2] ss:$0 sm:$0xff] }
  0x2d   : > { %1271 = vmatprep.subr.bf16.mxu0 %v1355_v3 }
  0x99   : > { %v1600_v21 = vpop.permute.xlu0 %586  ;;  %v1609_v32 = vpop.permute.xlu1 %581 }
  0x9d   : > { %v1606_v28 = vpop.permute.xlu0 %576 }
  0xe7   : > { %v1239_v15 = vpop.f32.mrf.mxu0 }
  0xe8   : > { %v507_v20 = vpack.c.bf16 %v1239_v15, %v1239_v15  ;;  %v1357_v15 = vld [vmem:[%s1751_s9 + $0x8] sm:$0xff]  }
  0xe9   : > { %v492_v16 = vpop.f32.mrf.mxu0 }
  0xeb   : > { %v1240_v17 = vpop.f32.mrf.mxu0 }
  0xec   : > { %v1187_v17 = vld [vmem:[%s1750_s8] ss:$0 sm:$0xff] }
  0xed   : > { %v495_v18 = vpop.f32.mrf.mxu0 }
  0xee   : > { %v506_v19 = vpack.c.bf16 %v495_v18, %v492_v16  ;;  %v1358_v16 = vld [vmem:[%s1751_s9] sm:$0xff]  }
  0xf0   : > { %1243 = vmatprep.mubr.msk.bf16.mxu1 %vm516_vm2, %v506_v19 }
  0xf1   : > { %1244 = vmatmul.mubr.msk.bf16.vlgmr.msra.gmra.mxu1 %vm516_vm2, %v507_v20 }
  0xf2   : > { %1251 = vmatprep.mubr.msk.bf16.mxu1 %vm447_vm0, %v1571_v1 }
 0x1b1   : > { %v1245_v23 = vpop.f32.mrf.mxu1 }
 0x1b2   : > { %v569_v24 = vadd.f32 %v1245_v23, %v1175_v22 }
 0x1b3   : > { %v560_v25 = vpop.f32.mrf.mxu1 }
 0x1b4   : > { %v591_v26 = vmul.f32 %v1600_v21, %v569_v24  ;;  %v561_v27 = vadd.f32 %v1175_v22, %v560_v25 }
 0x1b5   : > { %v1246_v29 = vpop.f32.mrf.mxu1 }
 0x1b6   : > { %1359 = vtanh.f32 %v591_v26  ;;  %v589_v30 = vmul.f32 %v1606_v28, %v561_v27 }
 0x1b7   : > { %v563_v31 = vpop.f32.mrf.mxu1 }
 0x1b8   : > { %v564_v33 = vadd.f32 %v1175_v22, %v563_v31  ;;  %1361 = vtanh.f32 %v589_v30 }
 0x1ba   : > { %v590_v34 = vmul.f32 %v1609_v32, %v564_v33 }
 0x1bc   : > { %1363 = vtanh.f32 %v590_v34 }
 0x1c3   : > { %v1612_v35 = vpop.eup %1359 }
 0x1c4   : > { %v596_v36 = vpack.c.bf16 %v1612_v35, %v1612_v35 }
 0x1c5   : > { %v1618_v38 = vpop.eup %1361 }
 0x1c6   : > { %1297 = vmatprep.subr.msk.bf16.mxu1 %vm454_vm1, %v596_v36  ;;  %v598_v37 = vsel %vm454_vm1, %v596_v36, 0 }
 0x1c7   : > { %1248 = vmatpush3.bf16.msra.mxu1 %v598_v37 }
 0x1c9   : > { %v1620_v39 = vpop.eup %1363 }
 0x1ca   : > { %v595_v40 = vpack.c.bf16 %v1620_v39, %v1618_v38 }
 0x1cc   : > { %1249 = vmatprep.subr.bf16.mxu1 %v595_v40 }
 0x1cd   : > { %1250 = vmatpush3.bf16.msra.mxu1 %v595_v40 }
 0x1d0   : > { %1252 = vmatmul.mubr.msk.bf16.vlgmr.msra.gmra.mxu1 %vm447_vm0, %v1577_v8 }
 0x1d1   : > { %1267 = vmatprep.mubr.msk.bf16.mxu1 %vm447_vm0, %v1571_v1 }
 0x290   : > { %v1253_v43 = vpop.f32.mrf.mxu1 }
 0x291   : > { %v649_v48 = vpack.c.bf16 %v1253_v43, %v1253_v43 }
 0x292   : > { %v634_v44 = vpop.f32.mrf.mxu1 }
 0x294   : > { %v1254_v45 = vpop.f32.mrf.mxu1 }
 0x296   : > { %v637_v46 = vpop.f32.mrf.mxu1 }
 0x297   : > { %v648_v47 = vpack.c.bf16 %v637_v46, %v634_v44 }
 0x299   : > { %1259 = vmatprep.mubr.msk.bf16.mxu0 %vm673_vm3, %v648_v47 }
 0x29a   : > { %1260 = vmatmul.mubr.msk.bf16.vlgmr.msra.gmra.mxu0 %vm673_vm3, %v649_v48 }
 0x29b   : > { %1272 = vmatpush3.bf16.msra.mxu0 %v1355_v3 }
 0x29c   : > { %1273 = vmatprep.subr.bf16.mxu0 %v1356_v4 }
 0x29f   : > { %1274 = vmatpush3.bf16.msra.mxu0 %v1356_v4 }
 0x35a   : > { %v1261_v50 = vpop.f32.mrf.mxu0 }
 0x35b   : > { %v723_v51 = vadd.f32 %v1261_v50, %v1180_v49 }
 0x35c   : > { %v714_v52 = vpop.f32.mrf.mxu0 }
 0x35d   : > { %v730_v53 = vmul.f32 %v723_v51, %v1600_v21  ;;  %v715_v54 = vadd.f32 %v1180_v49, %v714_v52 }
 0x35e   : > { %v1262_v55 = vpop.f32.mrf.mxu0 }
 0x35f   : > { %1365 = vtanh.f32 %v730_v53  ;;  %v728_v56 = vmul.f32 %v715_v54, %v1606_v28 }
 0x360   : > { %v717_v57 = vpop.f32.mrf.mxu0 }
 0x361   : > { %v718_v58 = vadd.f32 %v1180_v49, %v717_v57  ;;  %1367 = vtanh.f32 %v728_v56 }
 0x363   : > { %v729_v59 = vmul.f32 %v718_v58, %v1609_v32 }
 0x365   : > { %1369 = vtanh.f32 %v729_v59 }
 0x36c   : > { %v1366_v60 = vpop.eup %1365 }
 0x36d   : > { %1017 = vrot.lane.b32.xlu1 %v1366_v60, %s1446_s30  ;;  %v735_v61 = vpack.c.bf16 %v1366_v60, %v1366_v60 }
 0x36e   : > { %v1368_v63 = vpop.eup %1367 }
 0x36f   : > { %1298 = vmatprep.subr.msk.bf16.mxu1 %vm454_vm1, %v735_v61  ;;  %v737_v62 = vsel %vm454_vm1, %v735_v61, 0 }
 0x370   : > { %1264 = vmatpush3.bf16.msra.mxu1 %v737_v62 }
 0x371   : > { %1013 = vrot.lane.b32.xlu1 %v1368_v63, %s1446_s30 }
 0x372   : > { %v1370_v0 = vpop.eup %1369 }
 0x373   : > { %1015 = vrot.lane.b32.xlu0 %v1370_v0, %s1446_s30  ;;  %v734_v2 = vpack.c.bf16 %v1370_v0, %v1368_v63  ;;  %s1447_s30 = smov 64  }
 0x375   : > { %1265 = vmatprep.subr.bf16.mxu1 %v734_v2 }
 0x376   : > { %1266 = vmatpush3.bf16.msra.mxu1 %v734_v2 }
 0x377   : > { %1279 = vmatprep.subr.bf16.mxu1 %v1357_v15 }
 0x379   : > { %1268 = vmatmul.mubr.msk.bf16.vlgmr.msra.gmra.mxu1 %vm447_vm0, %v1577_v8 }
 0x37a   : > { %1280 = vmatpush3.bf16.msra.mxu1 %v1357_v15 }
 0x37b   : > { %1281 = vmatprep.subr.bf16.mxu1 %v1358_v16 }
 0x37e   : > { %1282 = vmatpush3.bf16.msra.mxu1 %v1358_v16 }
 0x3e5   : > { %v1016_v55 = vpop.permute.xlu0 %1015 }
 0x3e6   : > { %v1047_v0 = vsel %vm673_vm3, %v1620_v39, %v1016_v55 }
 0x439   : > { %v1269_v5 = vpop.f32.mrf.mxu1 }
 0x43a   : > { %v788_v11 = vpack.c.bf16 %v1269_v5, %v1269_v5 }
 0x43b   : > { %v773_v6 = vpop.f32.mrf.mxu1 }
 0x43d   : > { %v1270_v7 = vpop.f32.mrf.mxu1 }
 0x43f   : > { %v776_v9 = vpop.f32.mrf.mxu1 }
 0x440   : > { %v787_v10 = vpack.c.bf16 %v776_v9, %v773_v6 }
 0x442   : > { %1275 = vmatprep.mubr.msk.bf16.mxu0 %vm673_vm3, %v787_v10 }
 0x443   : > { %1276 = vmatmul.mubr.msk.bf16.vlgmr.msra.gmra.mxu0 %vm673_vm3, %v788_v11 }
 0x444   : > { %1291 = vmatprep.mubr.msk.bf16.mxu0 %vm447_vm0, %v1571_v1 }
 0x503   : > { %v1277_v18 = vpop.f32.mrf.mxu0 }
 0x504   : > { %v861_v19 = vadd.f32 %v1277_v18, %v1187_v17 }
 0x505   : > { %v852_v20 = vpop.f32.mrf.mxu0 }
 0x506   : > { %v868_v1 = vmul.f32 %v861_v19, %v1600_v21  ;;  %v853_v22 = vadd.f32 %v1187_v17, %v852_v20 }
 0x507   : > { %v1278_v23 = vpop.f32.mrf.mxu0 }
 0x508   : > { %1371 = vtanh.f32 %v868_v1  ;;  %v866_v24 = vmul.f32 %v853_v22, %v1606_v28 }
 0x509   : > { %v855_v25 = vpop.f32.mrf.mxu0 }
 0x50a   : > { %v856_v26 = vadd.f32 %v1187_v17, %v855_v25  ;;  %1373 = vtanh.f32 %v866_v24 }
 0x50c   : > { %v867_v27 = vmul.f32 %v856_v26, %v1609_v32 }
 0x50e   : > { %1375 = vtanh.f32 %v867_v27 }
 0x515   : > { %v1372_v29 = vpop.eup %1371 }
 0x516   : > { %1029 = vrot.lane.b32.xlu0 %v1372_v29, %s1447_s30  ;;  %v873_v21 = vpack.c.bf16 %v1372_v29, %v1372_v29 }
 0x517   : > { %v1374_v30 = vpop.eup %1373 }
 0x51a   : > { %1025 = vrot.lane.b32.xlu0 %v1374_v30, %s1447_s30 }
 0x51b   : > { %v1376_v31 = vpop.eup %1375 }
 0x51c   : > { %1027 = vrot.lane.b32.xlu1 %v1376_v31, %s1447_s30  ;;  %v872_v33 = vpack.c.bf16 %v1376_v31, %v1374_v30  ;;  %s1449_s30 = smov [#allocation3]  }
 0x51e   : > { %1283 = vmatprep.mubr.msk.bf16.mxu1 %vm673_vm3, %v872_v33 }
 0x51f   : > { %1284 = vmatmul.mubr.msk.bf16.vlgmr.msra.gmra.mxu1 %vm673_vm3, %v873_v21 }
 0x5df   : > { %v1285_v28 = vpop.f32.mrf.mxu1 }
 0x5e0   : > { %v945_v34 = vpack.c.bf16 %v1285_v28, %v1285_v28 }
 0x5e1   : > { %v930_v36 = vpop.f32.mrf.mxu1 }
 0x5e2   : > { %v954_v37 = vsel %vm454_vm1, %v945_v34, 0  ;;  %1299 = vmatprep.subr.msk.bf16.mxu0 %vm454_vm1, %v945_v34 }
 0x5e3   : > { %v1286_v32 = vpop.f32.mrf.mxu1  ;;  %1288 = vmatpush3.bf16.msra.mxu0 %v954_v37 }
 0x5e5   : > { %v933_v40 = vpop.f32.mrf.mxu1 }
 0x5e6   : > { %v944_v41 = vpack.c.bf16 %v933_v40, %v930_v36 }
 0x5e8   : > { %1289 = vmatprep.subr.bf16.mxu0 %v944_v41 }
 0x5e9   : > { %1290 = vmatpush3.bf16.msra.mxu0 %v944_v41 }
 0x5ec   : > { %1292 = vmatmul.mubr.msk.bf16.vlgmr.msra.gmra.mxu0 %vm447_vm0, %v1577_v8 }
 0x6ac   : > { %v1293_v43 = vpop.f32.mrf.mxu0 }
 0x6ad   : > { %v999_v44 = vadd.f32 %v1293_v43, %v1196_v42 }
 0x6ae   : > { %v990_v45 = vpop.f32.mrf.mxu0 }
 0x6af   : > { %v991_v46 = vadd.f32 %v1196_v42, %v990_v45  ;;  %v1006_v49 = vmul.f32 %v999_v44, %v1589_v12  ;;  %v1030_v12 = vpop.permute.xlu0 %1029 }
 0x6b0   : > { %v1294_v47 = vpop.f32.mrf.mxu0 }
 0x6b1   : > { %v1004_v48 = vmul.f32 %v991_v46, %v1595_v14  ;;  %v1018_v14 = vpop.permute.xlu1 %1017 }
 0x6b2   : > { %v993_v50 = vpop.f32.mrf.mxu0  ;;  %v1048_v63 = vsel %vm673_vm3, %v1612_v35, %v1018_v14 }
 0x6b3   : > { %1377 = vtanh.f32 %v1004_v48  ;;  %v994_v51 = vadd.f32 %v1196_v42, %v993_v50 }
 0x6b4   : > { %1379 = vtanh.f32 %v1006_v49 }
 0x6b5   : > { %v1005_v52 = vmul.f32 %v994_v51, %v1591_v13  ;;  %v1014_v56 = vpop.permute.xlu1 %1013  ;;  %v1026_v13 = vpop.permute.xlu0 %1025 }
 0x6b6   : > { %v1046_v58 = vsel %vm673_vm3, %v1618_v38, %v1014_v56  ;;  %v1052_v38 = vsel %vm1049_vm5, %v1048_v63, %v1030_v12 }
 0x6b7   : > { %1381 = vtanh.f32 %v1005_v52  ;;  %v1050_v59 = vsel %vm1049_vm5, %v1046_v58, %v1026_v13 }
 0x6b9   : > { %v1028_v57 = vpop.permute.xlu1 %1027 }
 0x6ba   : > { %v1051_v2 = vsel %vm1049_vm5, %v1047_v0, %v1028_v57 }
 0x6c0   : > { %v1378_v8 = vpop.eup %1377 }
 0x6c1   : > { %1037 = vrot.lane.b32.xlu1 %v1378_v8, %s1448_s12  ;;  %v1380_v53 = vpop.eup %1379 }
 0x6c4   : > { %v1382_v54 = vpop.eup %1381 }
 0x6c5   : > { %1039 = vrot.lane.b32.xlu0 %v1382_v54, %s1448_s12  ;;  %1041 = vrot.lane.b32.xlu1 %v1380_v53, %s1448_s12  ;;  %s1387_s12 = sshll.u32 %s1449_s30, 4  ;;  %s1388_s12 = int_to_ptr.vmem [resolvable:$false] %s1387_s12 }
 0x6c6   : > { %s1389_s13 = scalar_lea.vmem %s1388_s12, 768  ;;  %p1390_p0 = scmp.lt.s32.totalorder %s1689_s17, %s1388_s12 }
 0x6c7   : > { %p1391_p1 = scmp.lt.s32.totalorder %s1389_s13, %s1383_s26 }
 0x6c9   : > { %p1392_p2 = por %p1391_p1, %p1390_p0 }
 0x6cb   : > { %p1393_p3 = pnand %p1392_p2, %p1386_p13 }
 0x733   : > { %v1038_v60 = vpop.permute.xlu1 %1037 }
 0x734   : > { %v1054_v61 = vsel %vm1053_vm4, %v1050_v59, %v1038_v60 }
 0x735   : > { %v1058_v62 = vsel %vm1057_vm6, %v1054_v61, 0.0 }
 0x736   : > { %1061 = vst [vmem:[%s411_s16] sm:$0xff] %v1058_v62 }
 0x737   : > { %v1040_v3 = vpop.permute.xlu0 %1039  ;;  %v1042_v4 = vpop.permute.xlu1 %1041 }
 0x738   : > { %v1055_v35 = vsel %vm1053_vm4, %v1051_v2, %v1040_v3  ;;  %v1056_v39 = vsel %vm1053_vm4, %v1052_v38, %v1042_v4 }
 0x739   : > { %v1059_v5 = vsel %vm1057_vm6, %v1055_v35, 0.0  ;;  %v1060_v6 = vsel %vm1057_vm6, %v1056_v39, 0.0 }
 0x73a   : > { %1062 = vst [vmem:[%s411_s16 + $0x8] sm:$0xff] %v1059_v5  ;;  %1063 = vst [vmem:[%s411_s16 + $0x10] sm:$0xff] %v1060_v6 }
 0x73b   : > { %1396 = shalt.err (!%p1393_p3)
}
 0x73c   : > { %s1397_s14 = scalar_lea.hbm %s1694_s23, 384  ;;  %s1401_s10 = scalar_lea.hbm %s1753_s11, 768 }
 0x73d   : > { %p1398_p4 = scmp.ne.s32.totalorder %s1694_s23, %s1397_s14  ;;  %p1402_p9 = scmp.lt.s32.totalorder %s1694_s23, %s1753_s11 }
 0x73e   : > { %p1403_p10 = scmp.lt.s32.totalorder %s1401_s10, %s1397_s14 }
 0x73f   : > { %p1399_p7 = pnand %p1398_p4, %p1553_p5 }
 0x740   : > { %p1404_p11 = por %p1403_p10, %p1402_p9 }
 0x741   : > { %p1400_p8 = pneg %p1399_p7 }
 0x743   : > { %p1405_p12 = pnand %p1404_p11, %p1400_p8 }
 0x745   : > { %1408 = shalt.err (!%p1405_p12)
}
 0x746   : > { %s1450_s26 = smov 128   ;;  %s1451_s12 = smov 8  }
 0x747   : > { %1304 = dma.vmem_to_hbm [thread:$0]  (%p1553_p5), %s1689_s17, 384, %s1694_s23, %s1702_s25, %s1450_s26, %s1450_s26, %s1451_s12  }
 0x748 PF: > { %p1310_p13 = scmp.ge.s32.totalorder %s1443_s22, 2  ;;  %s1093_s13 = sand.u32 1, %s1431_s19  }
 0x749   : > { %s1094_s14 = scalar_lea.sflag [#allocation4], %s1093_s13 }
 0x74a   : > { %p1307_p0 = pnand %p1310_p13, %p1557_p6 }
 0x74c   : > { %p1308_p1 = pneg %p1307_p0 }
 0x74e   : > { %1426 = dma.done.wait (%p1308_p1), %s1094_s14, 384  }
 0x74f   : > { %1428 = vsyncadd (%p1308_p1), %s1094_s14, 4294966912  ;;  %p23_p2 = scmp.ge.s32.totalorder %s1540_s24, 4   ;;  %s1756_s19 = smov %s1435_s20 }
 0x750   : > { %s1757_s20 = smov %s1439_s21  ;;  %s1758_s21 = smov %s1551_s27 }
 0x751   : > { %s1759_s22 = smov %s1540_s24  ;;  %25 = sbr.rel (!%p23_p2) target bundleno = 6 (0x6), region = 105 }
 0x756   :  { %1099 = vsyncpa [#allocation4], 1 }
 0x757   :  { %1101 = vsyncpa [#allocation4 + $0x1], 1 }

</bundles_post_ra>
